<compile_context>
chip_gen: v6e
topology: v6e:2x2x1
jax: 0.10.0
libtpu: 0.0.40
codegen_flags: <defaults>
</compile_context>

<pallas_src>
import functools

import jax
import jax.numpy as jnp
from jax.experimental import pallas as pl
from jax.experimental.pallas import tpu as pltpu


MARGIN = 1.0
EPS = 1e-6                       # nn.PairwiseDistance default eps
DEFAULT_BLOCK_B = 4096           # target batch rows per grid step (multiple of 128)
VMEM_INPUT_BUDGET = 24 * 1024 * 1024   # budget for double-buffered input blocks


def _round_up(x, m):
    return (x + m - 1) // m * m


def _transd_hinge_kernel(ph, php, pt, ptp, pr, prp,
                         nh, nhp, nt, ntp, nr, nrp,
                         o_ref, *, margin, eps):
    """Per-block hinge; operands laid out (dim, Bt) with batch on the lane axis.

    entity refs:   (De, Bt)   relation refs: (Dr, Bt)
    o_ref:         (1, Bt)    per-sample hinge relu(pos - neg + margin)
    """

    def score(h_ref, hp_ref, t_ref, tp_ref, r_ref, rp_ref):
        h, hp = h_ref[...], hp_ref[...]
        t, tp = t_ref[...], tp_ref[...]
        rv, rp = r_ref[...], rp_ref[...]
        de = h.shape[0]
        dr = rv.shape[0]
        m = min(de, dr)

        # Fused TransD projection difference:
        #   (Mrh h + r) - (Mrt t) + eps
        #     = rp*((hp.h) - (tp.t)) + r + eps + eye(Dr, De) @ (h - t)
        diff_dot = jnp.sum(hp * h - tp * t, axis=0, keepdims=True)      # (1, Bt)
        d = rp * diff_dot + rv + eps                                    # (Dr, Bt)
        ident = h[:m, :] - t[:m, :]                                     # (m, Bt)

        # Split L2 reduction instead of concatenating along the sublane axis:
        # eye(Dr, De) only touches the first m rows of d.
        dm = d[:m, :] + ident
        sq = jnp.sum(dm * dm, axis=0, keepdims=True)                    # (1, Bt)
        if dr > m:
            tail = d[m:, :]
            sq = sq + jnp.sum(tail * tail, axis=0, keepdims=True)
        return jnp.sqrt(sq)                                             # (1, Bt)

    pos = score(ph, php, pt, ptp, pr, prp)
    neg = score(nh, nhp, nt, ntp, nr, nrp)
    o_ref[...] = jnp.maximum(pos - neg + margin, 0.0)


def transd_forward(posX, negX, params, *, margin=MARGIN, eps=EPS,
                   block_b=DEFAULT_BLOCK_B):
    """TransD.forward(posX, negX): scalar margin-ranking loss."""
    ent, entp, rel, relp = params
    entity_dim = ent.shape[1]
    relation_dim = rel.shape[1]
    batch = posX.shape[0]

    # ---- batch-tile selection (VMEM-budget aware, >= 2 parallel blocks) ----
    bytes_per_sample = (8 * entity_dim + 4 * relation_dim) * 4   # f32 inputs
    budget_bt = VMEM_INPUT_BUDGET // (2 * bytes_per_sample)      # double-buffered
    budget_bt = max(128, (budget_bt // 128) * 128)

    b128 = _round_up(batch, 128)
    bt = min(block_b, budget_bt, b128)
    if b128 >= 256:
        # Keep >= 2 grid blocks so the "parallel" axis can use both v7x cores.
        bt = min(bt, _round_up(b128 // 2, 128))
    bt = max(128, (bt // 128) * 128)

    b_pad = _round_up(batch, bt)
    num_blocks = b_pad // bt

    # Pad the index triples (cheap) to the block boundary; padded rows gather
    # entity/relation 0 and are dropped before the final reduction.
    def pad_idx(x):
        if b_pad == batch:
            return x
        return jnp.concatenate(
            [x, jnp.zeros((b_pad - batch, x.shape[1]), x.dtype)], axis=0)

    posXp = pad_idx(posX)
    negXp = pad_idx(negX)

    # Row-major gathers (never transpose the full tables); only the small
    # gathered (B, dim) slabs are transposed into the batch-on-lanes layout.
    def gather(x):
        h, r, t = x[:, 0], x[:, 1], x[:, 2]
        return (ent[h].T, entp[h].T, ent[t].T, entp[t].T,
                rel[r].T, relp[r].T)

    pos_ops = gather(posXp)   # ph, php, pt, ptp, pr, prp  -> (De|Dr, b_pad)
    neg_ops = gather(negXp)   # nh, nhp, nt, ntp, nr, nrp

    ent_spec = pl.BlockSpec((entity_dim, bt), lambda i: (0, i))
    rel_spec = pl.BlockSpec((relation_dim, bt), lambda i: (0, i))
    in_specs = ([ent_spec] * 4 + [rel_spec] * 2) * 2

    # Computed VMEM limit: double-buffered input blocks + slack, capped at
    # 32 MiB so v7x (64 MiB physical per TC) keeps headroom.
    in_block_bytes = bytes_per_sample * bt
    vmem_limit = min(32 * 1024 * 1024, 2 * in_block_bytes + 8 * 1024 * 1024)

    kernel = functools.partial(_transd_hinge_kernel, margin=margin, eps=eps)

    hinge = pl.pallas_call(
        kernel,
        grid=(num_blocks,),
        in_specs=in_specs,
        out_specs=pl.BlockSpec((1, bt), lambda i: (0, i)),
        out_shape=jax.ShapeDtypeStruct((1, b_pad), jnp.float32),
        compiler_params=pltpu.CompilerParams(
            dimension_semantics=("parallel",),
            vmem_limit_bytes=vmem_limit,
        ),
    )(*pos_ops, *neg_ops)

    # Drop padded tail samples, reduce, normalize by the true batch size.
    return jnp.sum(hinge[0, :batch]) / batch


def transd_forward_ref(posX, negX, params, *, margin=MARGIN, eps=EPS):
    """Pure-JAX reference mirroring the PyTorch module (explicit Mrh/Mrt)."""
    ent, entp, rel, relp = params

    def score(x):
        h, r, t = x[:, 0], x[:, 1], x[:, 2]
        hd, hp = ent[h], entp[h]
        td, tp = ent[t], entp[t]
        rd, rp = rel[r], relp[r]
        Em, En = rd.shape[1], hd.shape[1]
        eye = jnp.eye(Em, En, dtype=jnp.float32)
        Mrh = rp[:, :, None] @ hp[:, None, :] + eye
        Mrt = rp[:, :, None] @ tp[:, None, :] + eye
        hproj = (Mrh @ hd[:, :, None])[:, :, 0]
        tproj = (Mrt @ td[:, :, None])[:, :, 0]
        d = (hproj + rd) - tproj + eps
        return jnp.sqrt(jnp.sum(d * d, axis=-1))

    pos = score(posX)
    neg = score(negX)
    return jnp.sum(jnp.maximum(pos - neg + margin, 0.0)) / posX.shape[0]


if __name__ == "__main__":
    def run_case(key, entity_num, relation_num, entity_dim, relation_dim, batch):
        k_e, k_ep, k_r, k_rp, k_p, k_n = jax.random.split(key, 6)
        ent = 0.5 * jax.random.normal(k_e, (entity_num, entity_dim), jnp.float32)
        entp = 0.5 * jax.random.normal(k_ep, (entity_num, entity_dim), jnp.float32)
        rel = 0.5 * jax.random.normal(k_r, (relation_num, relation_dim), jnp.float32)
        relp = 0.5 * jax.random.normal(k_rp, (relation_num, relation_dim), jnp.float32)
        params = (ent, entp, rel, relp)

        def make_triples(k):
            k1, k2, k3 = jax.random.split(k, 3)
            h = jax.random.randint(k1, (batch,), 0, entity_num, jnp.int32)
            r = jax.random.randint(k2, (batch,), 0, relation_num, jnp.int32)
            t = jax.random.randint(k3, (batch,), 0, entity_num, jnp.int32)
            return jnp.stack([h, r, t], axis=1)   # (B, 3) PyTorch-style triples

        posX = make_triples(k_p)
        negX = make_triples(k_n)

        loss = jax.block_until_ready(transd_forward(posX, negX, params))
        loss_ref = jax.block_until_ready(transd_forward_ref(posX, negX, params))

        assert jnp.isfinite(loss), "kernel produced non-finite loss"
        assert jnp.allclose(loss, loss_ref, rtol=1e-4, atol=1e-4), (
            f"mismatch: kernel={loss} ref={loss_ref}")
        return float(loss)

    key = jax.random.PRNGKey(0)
    k1, k2, k3 = jax.random.split(key, 3)

    # Small, module-consistent config (single batch tile).
    run_case(k1, entity_num=16, relation_num=8, entity_dim=32,
             relation_dim=32, batch=8)

    # Multi-block grid + padded batch tail + relation_dim < entity_dim.
    run_case(k2, entity_num=64, relation_num=16, entity_dim=32,
             relation_dim=16, batch=300)

    # relation_dim > entity_dim (exercises the split tail reduction) + 2 blocks.
    run_case(k3, entity_num=32, relation_num=8, entity_dim=16,
             relation_dim=32, batch=200)

    print("KERNEL_OK")
</pallas_src>

<mosaic_0001>
module attributes {stable_mosaic.version = 11 : i64} {
  func.func @_transd_hinge_kernel(%arg0: i32, %arg1: memref<32x128xf32, #tpu.memory_space<vmem>>, %arg2: memref<32x128xf32, #tpu.memory_space<vmem>>, %arg3: memref<32x128xf32, #tpu.memory_space<vmem>>, %arg4: memref<32x128xf32, #tpu.memory_space<vmem>>, %arg5: memref<32x128xf32, #tpu.memory_space<vmem>>, %arg6: memref<32x128xf32, #tpu.memory_space<vmem>>, %arg7: memref<32x128xf32, #tpu.memory_space<vmem>>, %arg8: memref<32x128xf32, #tpu.memory_space<vmem>>, %arg9: memref<32x128xf32, #tpu.memory_space<vmem>>, %arg10: memref<32x128xf32, #tpu.memory_space<vmem>>, %arg11: memref<32x128xf32, #tpu.memory_space<vmem>>, %arg12: memref<32x128xf32, #tpu.memory_space<vmem>>, %arg13: memref<1x128xf32, #tpu.memory_space<vmem>>) attributes {dimension_semantics = [#tpu.dimension_semantics<parallel>], iteration_bounds = array<i64: 1>, scalar_prefetch = 0 : i64, scratch_operands = 0 : i64, tpu.core_type = #tpu.core_type<tc>, window_params = [{transform_indices = @transform_0, window_bounds = array<i64: 32, 128>}, {transform_indices = @transform_1, window_bounds = array<i64: 32, 128>}, {transform_indices = @transform_2, window_bounds = array<i64: 32, 128>}, {transform_indices = @transform_3, window_bounds = array<i64: 32, 128>}, {transform_indices = @transform_4, window_bounds = array<i64: 32, 128>}, {transform_indices = @transform_5, window_bounds = array<i64: 32, 128>}, {transform_indices = @transform_6, window_bounds = array<i64: 32, 128>}, {transform_indices = @transform_7, window_bounds = array<i64: 32, 128>}, {transform_indices = @transform_8, window_bounds = array<i64: 32, 128>}, {transform_indices = @transform_9, window_bounds = array<i64: 32, 128>}, {transform_indices = @transform_10, window_bounds = array<i64: 32, 128>}, {transform_indices = @transform_11, window_bounds = array<i64: 32, 128>}, {transform_indices = @transform_12, window_bounds = array<i64: 1, 128>}]} {
    %c0 = arith.constant 0 : index
    %c0_0 = arith.constant 0 : index
    %0 = vector.load %arg1[%c0, %c0_0] : memref<32x128xf32, #tpu.memory_space<vmem>>, vector<32x128xf32>
    %c0_1 = arith.constant 0 : index
    %c0_2 = arith.constant 0 : index
    %1 = vector.load %arg2[%c0_1, %c0_2] : memref<32x128xf32, #tpu.memory_space<vmem>>, vector<32x128xf32>
    %c0_3 = arith.constant 0 : index
    %c0_4 = arith.constant 0 : index
    %2 = vector.load %arg3[%c0_3, %c0_4] : memref<32x128xf32, #tpu.memory_space<vmem>>, vector<32x128xf32>
    %c0_5 = arith.constant 0 : index
    %c0_6 = arith.constant 0 : index
    %3 = vector.load %arg4[%c0_5, %c0_6] : memref<32x128xf32, #tpu.memory_space<vmem>>, vector<32x128xf32>
    %c0_7 = arith.constant 0 : index
    %c0_8 = arith.constant 0 : index
    %4 = vector.load %arg5[%c0_7, %c0_8] : memref<32x128xf32, #tpu.memory_space<vmem>>, vector<32x128xf32>
    %c0_9 = arith.constant 0 : index
    %c0_10 = arith.constant 0 : index
    %5 = vector.load %arg6[%c0_9, %c0_10] : memref<32x128xf32, #tpu.memory_space<vmem>>, vector<32x128xf32>
    %6 = arith.mulf %1, %0 : vector<32x128xf32>
    %7 = arith.mulf %3, %2 : vector<32x128xf32>
    %8 = arith.subf %6, %7 : vector<32x128xf32>
    %cst = arith.constant dense<0.000000e+00> : vector<128xf32>
    %9 = vector.multi_reduction <add>, %8, %cst [0] : vector<32x128xf32> to vector<128xf32>
    %10 = vector.shape_cast %9 : vector<128xf32> to vector<1x128xf32>
    %11 = vector.broadcast %10 : vector<1x128xf32> to vector<32x128xf32>
    %12 = arith.mulf %5, %11 : vector<32x128xf32>
    %13 = arith.addf %12, %4 : vector<32x128xf32>
    %cst_11 = arith.constant 9.99999997E-7 : f32
    %14 = vector.broadcast %cst_11 : f32 to vector<32x128xf32>
    %15 = arith.addf %13, %14 : vector<32x128xf32>
    %16 = arith.subf %0, %2 : vector<32x128xf32>
    %17 = arith.addf %15, %16 : vector<32x128xf32>
    %18 = arith.mulf %17, %17 : vector<32x128xf32>
    %cst_12 = arith.constant dense<0.000000e+00> : vector<128xf32>
    %19 = vector.multi_reduction <add>, %18, %cst_12 [0] : vector<32x128xf32> to vector<128xf32>
    %20 = vector.shape_cast %19 : vector<128xf32> to vector<1x128xf32>
    %21 = math.sqrt %20 : vector<1x128xf32>
    %c0_13 = arith.constant 0 : index
    %c0_14 = arith.constant 0 : index
    %22 = vector.load %arg7[%c0_13, %c0_14] : memref<32x128xf32, #tpu.memory_space<vmem>>, vector<32x128xf32>
    %c0_15 = arith.constant 0 : index
    %c0_16 = arith.constant 0 : index
    %23 = vector.load %arg8[%c0_15, %c0_16] : memref<32x128xf32, #tpu.memory_space<vmem>>, vector<32x128xf32>
    %c0_17 = arith.constant 0 : index
    %c0_18 = arith.constant 0 : index
    %24 = vector.load %arg9[%c0_17, %c0_18] : memref<32x128xf32, #tpu.memory_space<vmem>>, vector<32x128xf32>
    %c0_19 = arith.constant 0 : index
    %c0_20 = arith.constant 0 : index
    %25 = vector.load %arg10[%c0_19, %c0_20] : memref<32x128xf32, #tpu.memory_space<vmem>>, vector<32x128xf32>
    %c0_21 = arith.constant 0 : index
    %c0_22 = arith.constant 0 : index
    %26 = vector.load %arg11[%c0_21, %c0_22] : memref<32x128xf32, #tpu.memory_space<vmem>>, vector<32x128xf32>
    %c0_23 = arith.constant 0 : index
    %c0_24 = arith.constant 0 : index
    %27 = vector.load %arg12[%c0_23, %c0_24] : memref<32x128xf32, #tpu.memory_space<vmem>>, vector<32x128xf32>
    %28 = arith.mulf %23, %22 : vector<32x128xf32>
    %29 = arith.mulf %25, %24 : vector<32x128xf32>
    %30 = arith.subf %28, %29 : vector<32x128xf32>
    %cst_25 = arith.constant dense<0.000000e+00> : vector<128xf32>
    %31 = vector.multi_reduction <add>, %30, %cst_25 [0] : vector<32x128xf32> to vector<128xf32>
    %32 = vector.shape_cast %31 : vector<128xf32> to vector<1x128xf32>
    %33 = vector.broadcast %32 : vector<1x128xf32> to vector<32x128xf32>
    %34 = arith.mulf %27, %33 : vector<32x128xf32>
    %35 = arith.addf %34, %26 : vector<32x128xf32>
    %cst_26 = arith.constant 9.99999997E-7 : f32
    %36 = vector.broadcast %cst_26 : f32 to vector<32x128xf32>
    %37 = arith.addf %35, %36 : vector<32x128xf32>
    %38 = arith.subf %22, %24 : vector<32x128xf32>
    %39 = arith.addf %37, %38 : vector<32x128xf32>
    %40 = arith.mulf %39, %39 : vector<32x128xf32>
    %cst_27 = arith.constant dense<0.000000e+00> : vector<128xf32>
    %41 = vector.multi_reduction <add>, %40, %cst_27 [0] : vector<32x128xf32> to vector<128xf32>
    %42 = vector.shape_cast %41 : vector<128xf32> to vector<1x128xf32>
    %43 = math.sqrt %42 : vector<1x128xf32>
    %44 = arith.subf %21, %43 : vector<1x128xf32>
    %cst_28 = arith.constant 1.000000e+00 : f32
    %45 = vector.broadcast %cst_28 : f32 to vector<1x128xf32>
    %46 = arith.addf %44, %45 : vector<1x128xf32>
    %cst_29 = arith.constant 0.000000e+00 : f32
    %47 = vector.broadcast %cst_29 : f32 to vector<1x128xf32>
    %48 = arith.maximumf %46, %47 : vector<1x128xf32>
    %c0_30 = arith.constant 0 : index
    %c0_31 = arith.constant 0 : index
    %49 = vector.load %arg13[%c0_30, %c0_31] : memref<1x128xf32, #tpu.memory_space<vmem>>, vector<1x128xf32>
    tpu.vector_store %arg13[%c0_30, %c0_31], %48 {strides = array<i32>} : memref<1x128xf32, #tpu.memory_space<vmem>>, vector<1x128xf32>,
    return
  }
  func.func @transform_0(%arg0: i32) -> (i32, i32) {
    %c0_i32 = arith.constant 0 : i32
    %c0_i32_0 = arith.constant 0 : i32
    return %c0_i32, %arg0 : i32, i32
  }
  func.func @transform_1(%arg0: i32) -> (i32, i32) {
    %c0_i32 = arith.constant 0 : i32
    %c0_i32_0 = arith.constant 0 : i32
    return %c0_i32, %arg0 : i32, i32
  }
  func.func @transform_2(%arg0: i32) -> (i32, i32) {
    %c0_i32 = arith.constant 0 : i32
    %c0_i32_0 = arith.constant 0 : i32
    return %c0_i32, %arg0 : i32, i32
  }
  func.func @transform_3(%arg0: i32) -> (i32, i32) {
    %c0_i32 = arith.constant 0 : i32
    %c0_i32_0 = arith.constant 0 : i32
    return %c0_i32, %arg0 : i32, i32
  }
  func.func @transform_4(%arg0: i32) -> (i32, i32) {
    %c0_i32 = arith.constant 0 : i32
    %c0_i32_0 = arith.constant 0 : i32
    return %c0_i32, %arg0 : i32, i32
  }
  func.func @transform_5(%arg0: i32) -> (i32, i32) {
    %c0_i32 = arith.constant 0 : i32
    %c0_i32_0 = arith.constant 0 : i32
    return %c0_i32, %arg0 : i32, i32
  }
  func.func @transform_6(%arg0: i32) -> (i32, i32) {
    %c0_i32 = arith.constant 0 : i32
    %c0_i32_0 = arith.constant 0 : i32
    return %c0_i32, %arg0 : i32, i32
  }
  func.func @transform_7(%arg0: i32) -> (i32, i32) {
    %c0_i32 = arith.constant 0 : i32
    %c0_i32_0 = arith.constant 0 : i32
    return %c0_i32, %arg0 : i32, i32
  }
  func.func @transform_8(%arg0: i32) -> (i32, i32) {
    %c0_i32 = arith.constant 0 : i32
    %c0_i32_0 = arith.constant 0 : i32
    return %c0_i32, %arg0 : i32, i32
  }
  func.func @transform_9(%arg0: i32) -> (i32, i32) {
    %c0_i32 = arith.constant 0 : i32
    %c0_i32_0 = arith.constant 0 : i32
    return %c0_i32, %arg0 : i32, i32
  }
  func.func @transform_10(%arg0: i32) -> (i32, i32) {
    %c0_i32 = arith.constant 0 : i32
    %c0_i32_0 = arith.constant 0 : i32
    return %c0_i32, %arg0 : i32, i32
  }
  func.func @transform_11(%arg0: i32) -> (i32, i32) {
    %c0_i32 = arith.constant 0 : i32
    %c0_i32_0 = arith.constant 0 : i32
    return %c0_i32, %arg0 : i32, i32
  }
  func.func @transform_12(%arg0: i32) -> (i32, i32) {
    %c0_i32 = arith.constant 0 : i32
    %c0_i32_0 = arith.constant 0 : i32
    return %c0_i32, %arg0 : i32, i32
  }
}

</mosaic_0001>

<bundles_post_ra>
// kernel: tpu_custom_call.1
= control target key start
LH: loop header
LB: loop body
LE: loop exit
PB: predicated region body
PF: predicated region fallthrough
CT: control target
= control target key end

     0   :  { %17 = vsyncpa [#allocation3], 0  ;;  %s914_s0 = inlined_call_operand.hbm [shape: f32[32,128], index: 0, kind: input, shape index: {}]   ;;  %s915_s1 = inlined_call_operand.hbm [shape: f32[32,128], index: 1, kind: input, shape index: {}]   ;;  %s916_s2 = inlined_call_operand.hbm [shape: f32[32,128], index: 2, kind: input, shape index: {}]   ;;  %s917_s3 = inlined_call_operand.hbm [shape: f32[32,128], index: 3, kind: input, shape index: {}]   ;;  %s918_s4 = inlined_call_operand.hbm [shape: f32[32,128], index: 4, kind: input, shape index: {}]   ;;  %s919_s5 = inlined_call_operand.hbm [shape: f32[32,128], index: 5, kind: input, shape index: {}]   ;;  %s920_s6 = inlined_call_operand.hbm [shape: f32[32,128], index: 6, kind: input, shape index: {}]   ;;  %s921_s7 = inlined_call_operand.hbm [shape: f32[32,128], index: 7, kind: input, shape index: {}]   ;;  %s922_s8 = inlined_call_operand.hbm [shape: f32[32,128], index: 8, kind: input, shape index: {}]   ;;  %s923_s9 = inlined_call_operand.hbm [shape: f32[32,128], index: 9, kind: input, shape index: {}]   ;;  %s924_s10 = inlined_call_operand.hbm [shape: f32[32,128], index: 10, kind: input, shape index: {}]   ;;  %s925_s11 = inlined_call_operand.hbm [shape: f32[32,128], index: 11, kind: input, shape index: {}]   ;;  %s926_s12 = inlined_call_operand.hbm [shape: f32[1,128], index: 12, kind: output, shape index: {}]  }
   0x1   :  { %18 = vsyncpa [#allocation6], 0 }
   0x2   :  { %19 = vsyncpa [#allocation9], 0 }
   0x3   :  { %20 = vsyncpa [#allocation12], 0 }
   0x4   :  { %21 = vsyncpa [#allocation15], 0 }
   0x5   :  { %22 = vsyncpa [#allocation18], 0 }
   0x6   :  { %23 = vsyncpa [#allocation21], 0 }
   0x7   :  { %24 = vsyncpa [#allocation4], 0  ;;  %s695_s21 = smov [#allocation5]   ;;  %s696_s23 = smov [#allocation8]  }
   0x8   :  { %s42_s22 = sshll.u32 %s695_s21, 4  ;;  %s66_s24 = sshll.u32 %s696_s23, 4  ;;  %s43_s22 = int_to_ptr.vmem [resolvable:$true] %s42_s22  ;;  %s67_s24 = int_to_ptr.vmem [resolvable:$true] %s66_s24 }
   0x9   :  { %s427_s25 = scalar_lea.vmem %s43_s22, 512  ;;  %p432_p1 = scmp.lt.s32.totalorder %s43_s22, %s43_s22 }
   0xa   :  { %p428_p0 = scmp.ne.s32.totalorder %s43_s22, %s427_s25  ;;  %p433_p2 = scmp.lt.s32.totalorder %s427_s25, %s427_s25 }
   0xc   :  { %p434_p3 = por %p433_p2, %p432_p1 }
   0xe   :  { %p435_p4 = pnand %p434_p3, %p428_p0 }
  0x10   :  { %438 = shalt.err (!%p435_p4)
}
  0x11   :  { %s697_s26 = smov 128   ;;  %s698_s27 = smov 8  }
  0x12   :  { %48 = dma.hbm_to_vmem [thread:$0]  %s915_s1, 512, %s43_s22, [#allocation6], %s697_s26, %s697_s26, %s698_s27  }
  0x13   :  { %s447_s30 = scalar_lea.vmem %s67_s24, 512  ;;  %p452_p6 = scmp.lt.s32.totalorder %s67_s24, %s67_s24 }
  0x14   :  { %p448_p5 = scmp.ne.s32.totalorder %s67_s24, %s447_s30  ;;  %p453_p7 = scmp.lt.s32.totalorder %s447_s30, %s447_s30 }
  0x16   :  { %p454_p8 = por %p453_p7, %p452_p6 }
  0x18   :  { %p455_p9 = pnand %p454_p8, %p448_p5 }
  0x1a   :  { %458 = shalt.err (!%p455_p9)
}
  0x1b   :  { %72 = dma.hbm_to_vmem [thread:$0]  %s917_s3, 512, %s67_s24, [#allocation9], %s697_s26, %s697_s26, %s698_s27  }
  0x1c   :  { %s699_s15 = smov [#allocation11]   ;;  %s700_s17 = smov [#allocation14]  }
  0x1d   :  { %s90_s16 = sshll.u32 %s699_s15, 4  ;;  %s114_s18 = sshll.u32 %s700_s17, 4  ;;  %s91_s16 = int_to_ptr.vmem [resolvable:$true] %s90_s16  ;;  %s115_s18 = int_to_ptr.vmem [resolvable:$true] %s114_s18 }
  0x1e   :  { %s467_s1 = scalar_lea.vmem %s91_s16, 512  ;;  %p472_p11 = scmp.lt.s32.totalorder %s91_s16, %s91_s16 }
  0x1f   :  { %p468_p10 = scmp.ne.s32.totalorder %s91_s16, %s467_s1  ;;  %p473_p12 = scmp.lt.s32.totalorder %s467_s1, %s467_s1 }
  0x21   :  { %p474_p13 = por %p473_p12, %p472_p11 }
  0x23   :  { %p475_p0 = pnand %p474_p13, %p468_p10 }
  0x25   :  { %478 = shalt.err (!%p475_p0)
}
  0x26   :  { %96 = dma.hbm_to_vmem [thread:$0]  %s919_s5, 512, %s91_s16, [#allocation12], %s697_s26, %s697_s26, %s698_s27  }
  0x27   :  { %s487_s3 = scalar_lea.vmem %s115_s18, 512  ;;  %p492_p2 = scmp.lt.s32.totalorder %s115_s18, %s115_s18 }
  0x28   :  { %p488_p1 = scmp.ne.s32.totalorder %s115_s18, %s487_s3  ;;  %p493_p3 = scmp.lt.s32.totalorder %s487_s3, %s487_s3 }
  0x2a   :  { %p494_p4 = por %p493_p3, %p492_p2 }
  0x2c   :  { %p495_p5 = pnand %p494_p4, %p488_p1 }
  0x2e   :  { %498 = shalt.err (!%p495_p5)
}
  0x2f   :  { %120 = dma.hbm_to_vmem [thread:$0]  %s921_s7, 512, %s115_s18, [#allocation15], %s697_s26, %s697_s26, %s698_s27  }
  0x30   :  { %s701_s23 = smov [#allocation17]   ;;  %s702_s25 = smov [#allocation2]  }
  0x31   :  { %s138_s24 = sshll.u32 %s701_s23, 4  ;;  %s30_s28 = sshll.u32 %s702_s25, 4  ;;  %s139_s24 = int_to_ptr.vmem [resolvable:$true] %s138_s24  ;;  %s31_s28 = int_to_ptr.vmem [resolvable:$true] %s30_s28 }
  0x32   :  { %s507_s5 = scalar_lea.vmem %s139_s24, 512  ;;  %p512_p7 = scmp.lt.s32.totalorder %s139_s24, %s139_s24 }
  0x33   :  { %p508_p6 = scmp.ne.s32.totalorder %s139_s24, %s507_s5  ;;  %p513_p8 = scmp.lt.s32.totalorder %s507_s5, %s507_s5 }
  0x35   :  { %p514_p9 = por %p513_p8, %p512_p7 }
  0x37   :  { %p515_p10 = pnand %p514_p9, %p508_p6 }
  0x39   :  { %518 = shalt.err (!%p515_p10)
}
  0x3a   :  { %144 = dma.hbm_to_vmem [thread:$0]  %s923_s9, 512, %s139_s24, [#allocation18], %s697_s26, %s697_s26, %s698_s27  }
  0x3b   :  { %s527_s7 = scalar_lea.vmem %s31_s28, 512  ;;  %p532_p12 = scmp.lt.s32.totalorder %s31_s28, %s31_s28 }
  0x3c   :  { %p528_p11 = scmp.ne.s32.totalorder %s31_s28, %s527_s7  ;;  %p533_p13 = scmp.lt.s32.totalorder %s527_s7, %s527_s7 }
  0x3e   :  { %p534_p0 = por %p533_p13, %p532_p12 }
  0x40   :  { %p535_p1 = pnand %p534_p0, %p528_p11 }
  0x42   :  { %538 = shalt.err (!%p535_p1)
}
  0x43   :  { %36 = dma.hbm_to_vmem [thread:$0]  %s914_s0, 512, %s31_s28, [#allocation3], %s697_s26, %s697_s26, %s698_s27  }
  0x44   :  { %s703_s15 = smov [#allocation7]   ;;  %s704_s17 = smov [#allocation10]  }
  0x45   :  { %s54_s16 = sshll.u32 %s703_s15, 4  ;;  %s78_s18 = sshll.u32 %s704_s17, 4  ;;  %s55_s16 = int_to_ptr.vmem [resolvable:$true] %s54_s16  ;;  %s79_s18 = int_to_ptr.vmem [resolvable:$true] %s78_s18 }
  0x46   :  { %s547_s9 = scalar_lea.vmem %s55_s16, 512  ;;  %p552_p3 = scmp.lt.s32.totalorder %s55_s16, %s55_s16 }
  0x47   :  { %p548_p2 = scmp.ne.s32.totalorder %s55_s16, %s547_s9  ;;  %p553_p4 = scmp.lt.s32.totalorder %s547_s9, %s547_s9 }
  0x49   :  { %p554_p5 = por %p553_p4, %p552_p3 }
  0x4b   :  { %p555_p6 = pnand %p554_p5, %p548_p2 }
  0x4d   :  { %558 = shalt.err (!%p555_p6)
}
  0x4e   :  { %60 = dma.hbm_to_vmem [thread:$0]  %s916_s2, 512, %s55_s16, [#allocation6], %s697_s26, %s697_s26, %s698_s27  }
  0x4f   :  { %s567_s0 = scalar_lea.vmem %s79_s18, 512  ;;  %p572_p8 = scmp.lt.s32.totalorder %s79_s18, %s79_s18 }
  0x50   :  { %p568_p7 = scmp.ne.s32.totalorder %s79_s18, %s567_s0  ;;  %p573_p9 = scmp.lt.s32.totalorder %s567_s0, %s567_s0 }
  0x52   :  { %p574_p10 = por %p573_p9, %p572_p8 }
  0x54   :  { %p575_p11 = pnand %p574_p10, %p568_p7 }
  0x56   :  { %578 = shalt.err (!%p575_p11)
}
  0x57   :  { %84 = dma.hbm_to_vmem [thread:$0]  %s918_s4, 512, %s79_s18, [#allocation9], %s697_s26, %s697_s26, %s698_s27  }
  0x58   :  { %s705_s21 = smov [#allocation13]   ;;  %s706_s23 = smov [#allocation16]  }
  0x59   :  { %s102_s22 = sshll.u32 %s705_s21, 4  ;;  %s126_s24 = sshll.u32 %s706_s23, 4  ;;  %s103_s22 = int_to_ptr.vmem [resolvable:$true] %s102_s22  ;;  %s127_s24 = int_to_ptr.vmem [resolvable:$true] %s126_s24 }
  0x5a   :  { %s587_s2 = scalar_lea.vmem %s103_s22, 512  ;;  %p592_p13 = scmp.lt.s32.totalorder %s103_s22, %s103_s22 }
  0x5b   :  { %p588_p12 = scmp.ne.s32.totalorder %s103_s22, %s587_s2  ;;  %p593_p0 = scmp.lt.s32.totalorder %s587_s2, %s587_s2 }
  0x5d   :  { %p594_p1 = por %p593_p0, %p592_p13 }
  0x5f   :  { %p595_p2 = pnand %p594_p1, %p588_p12 }
  0x61   :  { %598 = shalt.err (!%p595_p2)
}
  0x62   :  { %108 = dma.hbm_to_vmem [thread:$0]  %s920_s6, 512, %s103_s22, [#allocation12], %s697_s26, %s697_s26, %s698_s27  }
  0x63   :  { %s607_s4 = scalar_lea.vmem %s127_s24, 512  ;;  %p612_p4 = scmp.lt.s32.totalorder %s127_s24, %s127_s24 }
  0x64   :  { %p608_p3 = scmp.ne.s32.totalorder %s127_s24, %s607_s4  ;;  %p613_p5 = scmp.lt.s32.totalorder %s607_s4, %s607_s4 }
  0x66   :  { %p614_p6 = por %p613_p5, %p612_p4 }
  0x68   :  { %p615_p7 = pnand %p614_p6, %p608_p3 }
  0x6a   :  { %618 = shalt.err (!%p615_p7)
}
  0x6b   :  { %132 = dma.hbm_to_vmem [thread:$0]  %s922_s8, 512, %s127_s24, [#allocation15], %s697_s26, %s697_s26, %s698_s27  }
  0x6c   :  { %s707_s30 = smov [#allocation19]   ;;  %s708_s13 = smov [#allocation20]  }
  0x6d   :  { %s150_s7 = sshll.u32 %s707_s30, 4  ;;  %s162_s14 = sshll.u32 %s708_s13, 4  ;;  %s151_s7 = int_to_ptr.vmem [resolvable:$true] %s150_s7  ;;  %s163_s14 = int_to_ptr.vmem [resolvable:$true] %s162_s14 }
  0x6e   :  { %s627_s6 = scalar_lea.vmem %s151_s7, 512  ;;  %p632_p9 = scmp.lt.s32.totalorder %s151_s7, %s151_s7 }
  0x6f   :  { %p628_p8 = scmp.ne.s32.totalorder %s151_s7, %s627_s6  ;;  %p633_p10 = scmp.lt.s32.totalorder %s627_s6, %s627_s6 }
  0x71   :  { %p634_p11 = por %p633_p10, %p632_p9 }
  0x73   :  { %p635_p12 = pnand %p634_p11, %p628_p8 }
  0x75   :  { %638 = shalt.err (!%p635_p12)
}
  0x76   :  { %156 = dma.hbm_to_vmem [thread:$0]  %s924_s10, 512, %s151_s7, [#allocation18], %s697_s26, %s697_s26, %s698_s27  }
  0x77   :  { %s647_s8 = scalar_lea.vmem %s163_s14, 512  ;;  %p652_p0 = scmp.lt.s32.totalorder %s163_s14, %s163_s14 }
  0x78   :  { %p648_p13 = scmp.ne.s32.totalorder %s163_s14, %s647_s8  ;;  %p653_p1 = scmp.lt.s32.totalorder %s647_s8, %s647_s8 }
  0x7a   :  { %p654_p2 = por %p653_p1, %p652_p0 }
  0x7c   :  { %p655_p3 = pnand %p654_p2, %p648_p13 }
  0x7e   :  { %658 = shalt.err (!%p655_p3)
}
  0x7f   :  { %168 = dma.hbm_to_vmem [thread:$0]  %s925_s11, 512, %s163_s14, [#allocation21], %s697_s26, %s697_s26, %s698_s27  }
  0x80   :  { %679 = dma.done.wait [#allocation3], 512  }
  0x81   :  { %680 = vsyncadd [#allocation3], 4294966784 }
  0x82   :  { %681 = dma.done.wait [#allocation6], 1024  }
  0x83   :  { %682 = vsyncadd [#allocation6], 4294966272 }
  0x84   :  { %683 = dma.done.wait [#allocation9], 1024  }
  0x85   :  { %684 = vsyncadd [#allocation9], 4294966272 }
  0x86   :  { %685 = dma.done.wait [#allocation12], 1024  }
  0x87   :  { %686 = vsyncadd [#allocation12], 4294966272 }
  0x88   :  { %687 = dma.done.wait [#allocation15], 1024  }
  0x89   :  { %688 = vsyncadd [#allocation15], 4294966272 }
  0x8a   :  { %689 = dma.done.wait [#allocation18], 1024  }
  0x8b   :  { %690 = vsyncadd [#allocation18], 4294966272 }
  0x8c   :  { %691 = dma.done.wait [#allocation21], 512  }
  0x8d   :  { %692 = vsyncadd [#allocation21], 4294966784  ;;  %v847_v0 = vld [vmem:[#allocation2] sm:$0xff]  ;;  %v849_v1 = vld [vmem:[#allocation2 + $0x8] sm:$0xff]  ;;  %s709_s10 = smov [#allocation22]  }
  0x8e   :  { %v851_v2 = vld [vmem:[#allocation2 + $0x10] sm:$0xff]  ;;  %v853_v3 = vld [vmem:[#allocation2 + $0x18] sm:$0xff]  ;;  %v209_v4 = vld [vmem:[#allocation5] sm:$0xff]  ;;  %s385_s11 = sshll.u32 %s709_s10, 4  ;;  %s386_s11 = int_to_ptr.vmem [resolvable:$true] %s385_s11 }
  0x8f   :  { %v210_v5 = vld [vmem:[#allocation5 + $0x8] sm:$0xff]  ;;  %v211_v6 = vld [vmem:[#allocation5 + $0x10] sm:$0xff]  ;;  %v212_v7 = vld [vmem:[#allocation5 + $0x18] sm:$0xff]  ;;  %v229_v12 = vmul.f32 %v209_v4, %v847_v0  ;;  %s659_s26 = scalar_lea.vmem %s386_s11, 16  ;;  %s663_s27 = scalar_lea.vmem %s386_s11, 32 }
  0x90   :  { %v855_v8 = vld [vmem:[#allocation7] sm:$0xff]  ;;  %v857_v9 = vld [vmem:[#allocation7 + $0x8] sm:$0xff]  ;;  %v859_v10 = vld [vmem:[#allocation7 + $0x10] sm:$0xff]  ;;  %v230_v13 = vmul.f32 %v210_v5, %v849_v1  ;;  %v231_v14 = vmul.f32 %v211_v6, %v851_v2  ;;  %v232_v19 = vmul.f32 %v212_v7, %v853_v3  ;;  %p660_p4 = scmp.ne.s32.totalorder %s386_s11, %s659_s26  ;;  %p664_p5 = scmp.lt.s32.totalorder %s386_s11, %s386_s11 }
  0x91   :  { %v861_v11 = vld [vmem:[#allocation7 + $0x18] sm:$0xff]  ;;  %v217_v15 = vld [vmem:[#allocation8] sm:$0xff]  ;;  %v218_v16 = vld [vmem:[#allocation8 + $0x8] sm:$0xff]  ;;  %p665_p6 = scmp.lt.s32.totalorder %s663_s27, %s659_s26 }
  0x92   :  { %v219_v17 = vld [vmem:[#allocation8 + $0x10] sm:$0xff]  ;;  %v220_v18 = vld [vmem:[#allocation8 + $0x18] sm:$0xff]  ;;  %v233_v20 = vmul.f32 %v217_v15, %v855_v8  ;;  %v234_v21 = vmul.f32 %v218_v16, %v857_v9  ;;  %v871_v27 = vld [vmem:[#allocation13] sm:$0xff] }
  0x93   :  { %v235_v22 = vmul.f32 %v219_v17, %v859_v10  ;;  %v236_v23 = vmul.f32 %v220_v18, %v861_v11  ;;  %v873_v28 = vld [vmem:[#allocation13 + $0x8] sm:$0xff]  ;;  %v875_v29 = vld [vmem:[#allocation13 + $0x10] sm:$0xff]  ;;  %v877_v32 = vld [vmem:[#allocation13 + $0x18] sm:$0xff]  ;;  %p666_p7 = por %p665_p6, %p664_p5 }
  0x94   :  { %v237_v24 = vsub.f32 %v229_v12, %v233_v20  ;;  %v238_v25 = vsub.f32 %v230_v13, %v234_v21  ;;  %v294_v33 = vld [vmem:[#allocation14] sm:$0xff]  ;;  %v295_v34 = vld [vmem:[#allocation14 + $0x8] sm:$0xff]  ;;  %v296_v35 = vld [vmem:[#allocation14 + $0x10] sm:$0xff] }
  0x95   :  { %v239_v26 = vsub.f32 %v231_v14, %v235_v22  ;;  %v240_v30 = vsub.f32 %v232_v19, %v236_v23  ;;  %v297_v36 = vld [vmem:[#allocation14 + $0x18] sm:$0xff]  ;;  %v879_v37 = vld [vmem:[#allocation16] sm:$0xff]  ;;  %v881_v39 = vld [vmem:[#allocation16 + $0x8] sm:$0xff]  ;;  %v314_v42 = vmul.f32 %v294_v33, %v871_v27  ;;  %v315_v43 = vmul.f32 %v295_v34, %v873_v28  ;;  %p667_p8 = pnand %p666_p7, %p660_p4 }
  0x96   :  { %v241_v31 = vadd.f32 %v238_v25, %v237_v24  ;;  %v883_v40 = vld [vmem:[#allocation16 + $0x10] sm:$0xff]  ;;  %v885_v41 = vld [vmem:[#allocation16 + $0x18] sm:$0xff]  ;;  %v316_v44 = vmul.f32 %v296_v35, %v875_v29  ;;  %v302_v45 = vld [vmem:[#allocation17] sm:$0xff]  ;;  %v317_v48 = vmul.f32 %v297_v36, %v877_v32 }
  0x97   :  { %v303_v46 = vld [vmem:[#allocation17 + $0x8] sm:$0xff]  ;;  %v304_v47 = vld [vmem:[#allocation17 + $0x10] sm:$0xff]  ;;  %v305_v50 = vld [vmem:[#allocation17 + $0x18] sm:$0xff]  ;;  %v318_v51 = vmul.f32 %v302_v45, %v879_v37 }
  0x98   :  { %v242_v38 = vadd.f32 %v241_v31, %v239_v26  ;;  %v319_v52 = vmul.f32 %v303_v46, %v881_v39  ;;  %v320_v53 = vmul.f32 %v304_v47, %v883_v40  ;;  %v321_v54 = vmul.f32 %v305_v50, %v885_v41  ;;  %v225_v6 = vld [vmem:[#allocation11] sm:$0xff]  ;;  %v226_v13 = vld [vmem:[#allocation11 + $0x8] sm:$0xff]  ;;  %v227_v14 = vld [vmem:[#allocation11 + $0x10] sm:$0xff] }
  0x99   :  { %v322_v56 = vsub.f32 %v314_v42, %v318_v51  ;;  %v228_v15 = vld [vmem:[#allocation11 + $0x18] sm:$0xff]  ;;  %v221_v16 = vld [vmem:[#allocation10] sm:$0xff]  ;;  %v222_v19 = vld [vmem:[#allocation10 + $0x8] sm:$0xff]  ;;  %v262_v26 = vsub.f32 %v847_v0, %v855_v8  ;;  %v264_v31 = vsub.f32 %v851_v2, %v859_v10  ;;  %v265_v42 = vsub.f32 %v853_v3, %v861_v11 }
  0x9a   :  { %v243_v49 = vadd.f32 %v242_v38, %v240_v30  ;;  %v323_v57 = vsub.f32 %v315_v43, %v319_v52  ;;  %v324_v58 = vsub.f32 %v316_v44, %v320_v53  ;;  %v325_v60 = vsub.f32 %v317_v48, %v321_v54  ;;  %v223_v20 = vld [vmem:[#allocation10 + $0x10] sm:$0xff]  ;;  %v224_v21 = vld [vmem:[#allocation10 + $0x18] sm:$0xff]  ;;  %v307_v3 = vld [vmem:[#allocation19 + $0x8] sm:$0xff] }
  0x9b   :  { %v263_v30 = vsub.f32 %v849_v1, %v857_v9  ;;  %v310_v9 = vld [vmem:[#allocation20] sm:$0xff]  ;;  %v312_v2 = vld [vmem:[#allocation20 + $0x10] sm:$0xff]  ;;  %v313_v50 = vld [vmem:[#allocation20 + $0x18] sm:$0xff] }
  0x9c   :  { %v244_v55 = vrot.slane %v243_v49, 4  ;;  %v326_v61 = vadd.f32 %v323_v57, %v322_v56  ;;  %v308_v11 = vld [vmem:[#allocation19 + $0x10] sm:$0xff]  ;;  %v309_v56 = vld [vmem:[#allocation19 + $0x18] sm:$0xff] }
  0x9e   :  { %v245_v59 = vadd.f32 %v244_v55, %v243_v49  ;;  %v327_v63 = vadd.f32 %v326_v61, %v324_v58  ;;  %v311_v49 = vld [vmem:[#allocation20 + $0x8] sm:$0xff]  ;;  %v306_v55 = vld [vmem:[#allocation19] sm:$0xff] }
  0xa0   :  { %v246_v62 = vrot.slane %v245_v59, 2  ;;  %v328_v5 = vadd.f32 %v327_v63, %v325_v60  ;;  %v347_v60 = vsub.f32 %v871_v27, %v879_v37 }
  0xa2   :  { %v247_v4 = vadd.f32 %v246_v62, %v245_v59  ;;  %v329_v12 = vrot.slane %v328_v5, 4 }
  0xa4   :  { %v248_v7 = vrot.slane %v247_v4, 1  ;;  %v330_v18 = vadd.f32 %v329_v12, %v328_v5  ;;  %v349_v12 = vsub.f32 %v875_v29, %v883_v40 }
  0xa6   :  { %v249_v17 = vadd.f32 %v248_v7, %v247_v4  ;;  %v331_v33 = vrot.slane %v330_v18, 2  ;;  %v348_v4 = vsub.f32 %v873_v28, %v881_v39 }
  0xa8   :  { %v250_v22 = vmul.f32 %v249_v17, %v225_v6  ;;  %v251_v23 = vmul.f32 %v249_v17, %v226_v13  ;;  %v252_v24 = vmul.f32 %v249_v17, %v227_v14  ;;  %v253_v25 = vmul.f32 %v249_v17, %v228_v15 }
  0xa9   :  { %v332_v43 = vadd.f32 %v331_v33, %v330_v18  ;;  %v350_v15 = vsub.f32 %v877_v32, %v885_v41 }
  0xaa   :  { %v254_v34 = vadd.f32 %v250_v22, %v221_v16  ;;  %v255_v35 = vadd.f32 %v251_v23, %v222_v19  ;;  %v256_v36 = vadd.f32 %v252_v24, %v223_v20  ;;  %v257_v38 = vadd.f32 %v253_v25, %v224_v21 }
  0xab   :  { %v333_v0 = vrot.slane %v332_v43, 1 }
  0xac   :  { %v258_v44 = vadd.f32 1e-06, %v254_v34  ;;  %v259_v45 = vadd.f32 1e-06, %v255_v35  ;;  %v260_v46 = vadd.f32 1e-06, %v256_v36 }
  0xad   :  { %v261_v47 = vadd.f32 1e-06, %v257_v38  ;;  %v334_v51 = vadd.f32 %v333_v0, %v332_v43 }
  0xae   :  { %v266_v8 = vadd.f32 %v262_v26, %v258_v44  ;;  %v267_v48 = vadd.f32 %v263_v30, %v259_v45  ;;  %v268_v1 = vadd.f32 %v264_v31, %v260_v46 }
  0xaf   :  { %v269_v10 = vadd.f32 %v265_v42, %v261_v47  ;;  %v335_v57 = vmul.f32 %v334_v51, %v310_v9  ;;  %v336_v58 = vmul.f32 %v334_v51, %v311_v49  ;;  %v337_v59 = vmul.f32 %v334_v51, %v312_v2 }
  0xb0   :  { %v270_v52 = vmul.f32 %v266_v8, %v266_v8  ;;  %v271_v53 = vmul.f32 %v267_v48, %v267_v48  ;;  %v272_v54 = vmul.f32 %v268_v1, %v268_v1  ;;  %v338_v63 = vmul.f32 %v334_v51, %v313_v50 }
  0xb1   :  { %v273_v61 = vmul.f32 %v269_v10, %v269_v10  ;;  %v339_v5 = vadd.f32 %v335_v57, %v306_v55  ;;  %v340_v6 = vadd.f32 %v336_v58, %v307_v3  ;;  %v341_v7 = vadd.f32 %v337_v59, %v308_v11 }
  0xb2   :  { %v274_v62 = vadd.f32 %v271_v53, %v270_v52  ;;  %v342_v14 = vadd.f32 %v338_v63, %v309_v56 }
  0xb3   :  { %v343_v16 = vadd.f32 1e-06, %v339_v5  ;;  %v344_v17 = vadd.f32 1e-06, %v340_v6  ;;  %v345_v27 = vadd.f32 1e-06, %v341_v7 }
  0xb4   :  { %v275_v13 = vadd.f32 %v274_v62, %v272_v54  ;;  %v346_v18 = vadd.f32 1e-06, %v342_v14 }
  0xb5   :  { %v351_v19 = vadd.f32 %v347_v60, %v343_v16  ;;  %v352_v20 = vadd.f32 %v348_v4, %v344_v17  ;;  %v353_v21 = vadd.f32 %v349_v12, %v345_v27 }
  0xb6   :  { %v276_v37 = vadd.f32 %v275_v13, %v273_v61  ;;  %v354_v39 = vadd.f32 %v350_v15, %v346_v18 }
  0xb7   :  { %v355_v22 = vmul.f32 %v351_v19, %v351_v19  ;;  %v356_v23 = vmul.f32 %v352_v20, %v352_v20  ;;  %v357_v24 = vmul.f32 %v353_v21, %v353_v21 }
  0xb8   :  { %v277_v28 = vrot.slane %v276_v37, 4  ;;  %v358_v29 = vmul.f32 %v354_v39, %v354_v39 }
  0xb9   :  { %v359_v40 = vadd.f32 %v356_v23, %v355_v22 }
  0xba   :  { %v278_v25 = vadd.f32 %v277_v28, %v276_v37 }
  0xbb   :  { %v360_v30 = vadd.f32 %v359_v40, %v357_v24 }
  0xbc   :  { %v279_v26 = vrot.slane %v278_v25, 2 }
  0xbd   :  { %v361_v32 = vadd.f32 %v360_v30, %v358_v29 }
  0xbe   :  { %v280_v31 = vadd.f32 %v279_v26, %v278_v25 }
  0xbf   :  { %v362_v33 = vrot.slane %v361_v32, 4 }
  0xc0   :  { %v281_v41 = vrot.slane %v280_v31, 1 }
  0xc1   :  { %v363_v35 = vadd.f32 %v362_v33, %v361_v32 }
  0xc2   :  { %v282_v34 = vadd.f32 %v281_v41, %v280_v31 }
  0xc3   :  { %v364_v36 = vrot.slane %v363_v35, 2 }
  0xc4   :  { %415 = vrsqrt.f32 %v282_v34  ;;  %vm285_vm0 = vcmp.eq.f32.partialorder %v282_v34, inf  ;;  %v288_v46 = vand.u32 2147483648, %v282_v34  ;;  %vm287_vm1 = vcmp.eq.f32.partialorder %v282_v34, 0.0 }
  0xc5   :  { %v365_v38 = vadd.f32 %v364_v36, %v363_v35 }
  0xc7   :  { %v366_v42 = vrot.slane %v365_v38, 1 }
  0xc9   :  { %v367_v43 = vadd.f32 %v366_v42, %v365_v38 }
  0xcb   :  { %417 = vrsqrt.f32 %v367_v43  ;;  %vm370_vm2 = vcmp.eq.f32.partialorder %v367_v43, inf  ;;  %v373_v8 = vand.u32 2147483648, %v367_v43  ;;  %vm372_vm3 = vcmp.eq.f32.partialorder %v367_v43, 0.0 }
  0xd1   :  { %v416_v44 = vpop.eup %415 }
  0xd2   :  { %v284_v45 = vmul.f32 %v416_v44, %v282_v34 }
  0xd4   :  { %v286_v47 = vsel %vm285_vm0, %v282_v34, %v284_v45 }
  0xd5   :  { %v289_v1 = vsel %vm287_vm1, %v288_v46, %v286_v47 }
  0xd8   :  { %v418_v0 = vpop.eup %417 }
  0xd9   :  { %v369_v48 = vmul.f32 %v418_v0, %v367_v43 }
  0xdb   :  { %v371_v9 = vsel %vm370_vm2, %v367_v43, %v369_v48 }
  0xdc   :  { %v374_v49 = vsel %vm372_vm3, %v373_v8, %v371_v9 }
  0xdd   :  { %v375_v2 = vsub.f32 %v289_v1, %v374_v49 }
  0xdf   :  { %v376_v10 = vadd.f32 1.0, %v375_v2 }
  0xe1   :  { %v377_v50 = vmax.f32 %v376_v10, 0.0 }
  0xe3   :  { %378 = vst [vmem:[#allocation22] sm:$0x1] %v377_v50 }
  0xe4   :  { %670 = shalt.err (!%p667_p8)
}
  0xe5   :  { %388 = dma.vmem_to_hbm [thread:$0]  %s386_s11, 16, %s926_s12, [#allocation4]  }
  0xe6   :  { %693 = dma.done.wait [#allocation4], 16  }
  0xe7   :  { %694 = vsyncadd [#allocation4], 4294967280 }
  0xe8   :  { %392 = vsyncpa [#allocation3], 1 }
  0xe9   :  { %393 = vsyncpa [#allocation6], 1 }
  0xea   :  { %394 = vsyncpa [#allocation9], 1 }
  0xeb   :  { %395 = vsyncpa [#allocation12], 1 }
  0xec   :  { %396 = vsyncpa [#allocation15], 1 }
  0xed   :  { %397 = vsyncpa [#allocation18], 1 }
  0xee   :  { %398 = vsyncpa [#allocation21], 1 }
  0xef   :  { %399 = vsyncpa [#allocation4], 1 }

</bundles_post_ra>
